<compile_context>
chip_gen: v5e
topology: v5e:2x2
jax: 0.10.0
libtpu: 0.0.40
codegen_flags: <defaults>
</compile_context>

<pallas_src>
import functools

import jax
import jax.numpy as jnp
from jax.experimental import pallas as pl
from jax.experimental.pallas import tpu as pltpu

_MIB = 1024 * 1024


def _round_up(x, m):
    return ((x + m - 1) // m) * m


def _round_down(x, m):
    return (x // m) * m


def _sublane_multiple(dtype):
    # Packed sublane multiple: 8 (f32), 16 (bf16/f16), 32 (int8/fp8).
    return max(8, 32 // jnp.dtype(dtype).itemsize)


def _default_block_bytes():
    # ~4 MiB blocks sit on the flat part of the roofline on v6e/v7x; v5's slower HBM
    # already hides the per-step cost at 2 MiB and its scoped-VMEM default is smaller.
    try:
        kind = jax.devices()[0].device_kind.lower()
    except Exception:  # pragma: no cover - defensive
        kind = ""
    return 2 * _MIB if "v5" in kind else 4 * _MIB


def _vmem_limit(block_in_bytes, block_f32_bytes):
    # 2x double-buffered in + out (input dtype) + ~3 block-sized f32 temporaries from
    # the upcast/roll/where chain + fixed headroom.  Clamp to [32, 48] MiB: never below
    # any chip's scoped default, never near v7x's 64 MiB physical VMEM.
    need = 4 * block_in_bytes + 3 * block_f32_bytes + 2 * _MIB
    return int(min(48 * _MIB, max(32 * _MIB, need)))


def _right_edge_mask(col, W):
    if (W & (W - 1)) == 0:
        return (col & (W - 1)) == W - 1  # pow2 W: single AND instead of remainder chain
    return col % W == W - 1


# ---------------------------------------------------------------------------
# Path A: whole flattened planes per block, block = (tb, H*W)
# ---------------------------------------------------------------------------
def _blur_kernel_flat(x_ref, o_ref, *, H, W):
    HW = H * W
    x = x_ref[...].astype(jnp.float32)  # (tb, H*W), accumulate in f32
    if W > 1 or H > 1:
        col = jax.lax.broadcasted_iota(jnp.int32, x.shape, 1)

    # Right neighbour x[h, min(w+1, W-1)]: lane-roll by -1, replicate the right edge.
    if W > 1:
        right = jnp.where(_right_edge_mask(col, W), x, pltpu.roll(x, HW - 1, axis=1))
    else:
        right = x

    # Fold: tmp[h,w] = x[h,w] + x[h,w+1^]; add tmp shifted down one image row
    # (replicated bottom edge) -> 2 shifts + 2 adds per element total.
    tmp = x + right
    if H > 1:
        down = jnp.where(col >= HW - W, tmp, pltpu.roll(tmp, HW - W, axis=1))
    else:
        down = tmp

    o_ref[...] = ((tmp + down) * 0.25).astype(o_ref.dtype)


def _pick_tb(B, sub, max_tb):
    """Planes per grid step for the flat path (tb multiple of `sub`, or == B)."""
    if B <= max_tb:
        # Whole batch fits one block.  Still split into exactly 2 steps so the
        # "parallel" grid axis can shard across both v7x TensorCores, provided both
        # halves can be sublane-aligned (otherwise the single-step grid is forced).
        if B >= 2 * sub:
            return _round_up(pl.cdiv(B, 2), sub)
        return B
    tb = max(sub, _round_down(max_tb, sub))
    # Prefer an even step count (v7x megacore: 2 TCs) without shrinking blocks < 2x.
    if pl.cdiv(B, tb) % 2 == 1:
        t = tb - sub
        while t >= max(sub, tb // 2):
            if pl.cdiv(B, t) % 2 == 0:
                return t
            t -= sub
    return tb


def _blur_flat(x, *, block_bytes, sub):
    N, C, H, W = x.shape
    B, HW = N * C, H * W
    itemsize = jnp.dtype(x.dtype).itemsize
    xf = x.reshape(B, HW)  # free reshape: the stencil never mixes (n, c)

    max_tb = max(1, block_bytes // (HW * itemsize))
    tb = _pick_tb(B, sub, max_tb)

    out = pl.pallas_call(
        functools.partial(_blur_kernel_flat, H=H, W=W),
        out_shape=jax.ShapeDtypeStruct((B, HW), x.dtype),
        grid=(pl.cdiv(B, tb),),
        in_specs=[pl.BlockSpec((tb, HW), lambda i: (i, 0))],
        out_specs=pl.BlockSpec((tb, HW), lambda i: (i, 0)),
        compiler_params=pltpu.CompilerParams(
            dimension_semantics=("parallel",),
            vmem_limit_bytes=_vmem_limit(tb * HW * itemsize, tb * HW * 4),
        ),
    )(xf)
    return out.reshape(N, C, H, W)


# ---------------------------------------------------------------------------
# Path B: large planes, tile along H with a 1-row halo (delivered as an 8-row block)
# ---------------------------------------------------------------------------
def _blur_kernel_rows(x_ref, halo_ref, o_ref, *, H, W, th):
    i = pl.program_id(1)  # H-tile index
    x = x_ref[0].astype(jnp.float32)  # (th, W)

    def shift_right(a):  # a[:, min(w+1, W-1)]
        if W == 1:
            return a
        col = jax.lax.broadcasted_iota(jnp.int32, a.shape, 1)
        return jnp.where(_right_edge_mask(col, W), a, pltpu.roll(a, W - 1, axis=1))

    tmp = x + shift_right(x)  # (th, W)

    # Halo = image row min((i+1)*th, H-1); it sits at sublane (row % 8) of the 8-row
    # halo block.  Select it branch-free (any padded rows are masked to 0 first).
    halo_row = jnp.minimum((i + 1) * th, H - 1)
    h8 = halo_ref[0].astype(jnp.float32)  # (8, W)
    row8 = jax.lax.broadcasted_iota(jnp.int32, (8, W), 0)
    halo = jnp.sum(jnp.where(row8 == halo_row % 8, h8, 0.0), axis=0, keepdims=True)
    tmp_h = halo + shift_right(halo)  # (1, W)

    # down[r] = tmp[r+1] within the tile; at the tile's last *valid* row use the halo
    # (which is the next image row, or the replicated last row for the final tile).
    last_valid = jnp.minimum(th, H - i * th) - 1
    row = jax.lax.broadcasted_iota(jnp.int32, (th, W), 0)
    down = jnp.where(row == last_valid, tmp_h, pltpu.roll(tmp, th - 1, axis=0))

    o_ref[0] = ((tmp + down) * 0.25).astype(o_ref.dtype)


def _blur_rows(x, *, block_bytes, sub):
    N, C, H, W = x.shape
    B = N * C
    itemsize = jnp.dtype(x.dtype).itemsize
    xr = x.reshape(B, H, W)

    th = max(sub, _round_down(block_bytes // (W * itemsize), sub))
    th = min(th, _round_up(H, sub))
    n_h = pl.cdiv(H, th)

    def x_map(b, i):
        return (b, i, 0)

    def halo_map(b, i):
        # 8-row block (block index along H) containing image row min((i+1)*th, H-1).
        return (b, jnp.minimum((i + 1) * th, H - 1) // 8, 0)

    block_in = (th + 8) * W * itemsize
    out = pl.pallas_call(
        functools.partial(_blur_kernel_rows, H=H, W=W, th=th),
        out_shape=jax.ShapeDtypeStruct((B, H, W), x.dtype),
        grid=(B, n_h),
        in_specs=[
            pl.BlockSpec((1, th, W), x_map),
            pl.BlockSpec((1, 8, W), halo_map),
        ],
        out_specs=pl.BlockSpec((1, th, W), x_map),
        compiler_params=pltpu.CompilerParams(
            dimension_semantics=("parallel", "parallel"),
            vmem_limit_bytes=_vmem_limit(block_in, th * W * 4),
        ),
    )(xr, xr)
    return out.reshape(N, C, H, W)


# ---------------------------------------------------------------------------
# Public wrapper
# ---------------------------------------------------------------------------
def blur(x, *, block_bytes=None):
    """Replicates PyTorch Blur.forward: (N, C, H, W) -> (N, C, H, W)."""
    N, C, H, W = x.shape
    B, HW = N * C, H * W
    itemsize = jnp.dtype(x.dtype).itemsize
    sub = _sublane_multiple(x.dtype)
    if block_bytes is None:
        block_bytes = _default_block_bytes()

    # Flat path whenever a sublane-aligned batch of whole planes fits the block budget
    # (also covers B < sub with a tb == B block); otherwise H-tile with a halo.
    if min(B, sub) * HW * itemsize <= block_bytes:
        return _blur_flat(x, block_bytes=block_bytes, sub=sub)
    return _blur_rows(x, block_bytes=block_bytes, sub=sub)


def blur_reference(x):
    # Pure-JAX reference: replication pad (right=1, bottom=1) + 2x2 mean, stride 1.
    xp = jnp.pad(x, ((0, 0), (0, 0), (0, 1), (0, 1)), mode="edge")
    return 0.25 * (
        xp[:, :, :-1, :-1]
        + xp[:, :, :-1, 1:]
        + xp[:, :, 1:, :-1]
        + xp[:, :, 1:, 1:]
    )


if __name__ == "__main__":
    key = jax.random.PRNGKey(0)

    # Primary shape from the module spec: (N, C, H, W) = (2, 4, 16, 16).
    x = jax.random.normal(key, (2, 4, 16, 16), dtype=jnp.float32)
    out = jax.block_until_ready(blur(x))
    assert out.shape == x.shape, (out.shape, x.shape)
    assert jnp.allclose(out, blur_reference(x), atol=1e-5, rtol=1e-5), "flat path mismatch"

    # Larger batch: exercises the new >=2-step (megacore) tb selection, still small.
    x2 = jax.random.normal(jax.random.PRNGKey(0), (4, 16, 16, 16), dtype=jnp.float32)
    out2 = jax.block_until_ready(blur(x2))
    assert jnp.allclose(out2, blur_reference(x2), atol=1e-5, rtol=1e-5), "multi-step mismatch"

    # H-tiled halo path, forced with a tiny block budget; H=60 gives a partial last
    # H-tile and an off-aligned halo row.
    x3 = jax.random.normal(jax.random.PRNGKey(0), (1, 2, 60, 128), dtype=jnp.float32)
    out3 = jax.block_until_ready(blur(x3, block_bytes=8 * 1024))
    assert jnp.allclose(out3, blur_reference(x3), atol=1e-5, rtol=1e-5), "rows path mismatch"

    print("KERNEL_OK")
</pallas_src>

<mosaic_0001>
module attributes {stable_mosaic.version = 11 : i64} {
  func.func @_blur_kernel_flat(%arg0: i32, %arg1: memref<8x256xf32, #tpu.memory_space<vmem>>, %arg2: memref<8x256xf32, #tpu.memory_space<vmem>>) attributes {dimension_semantics = [#tpu.dimension_semantics<parallel>], iteration_bounds = array<i64: 1>, scalar_prefetch = 0 : i64, scratch_operands = 0 : i64, tpu.core_type = #tpu.core_type<tc>, window_params = [{transform_indices = @transform_0, window_bounds = array<i64: 8, 256>}, {transform_indices = @transform_1, window_bounds = array<i64: 8, 256>}]} {
    %c0 = arith.constant 0 : index
    %c0_0 = arith.constant 0 : index
    %0 = vector.load %arg1[%c0, %c0_0] : memref<8x256xf32, #tpu.memory_space<vmem>>, vector<8x256xf32>
    %1 = tpu.iota {dimensions = array<i32: 1>} : vector<8x256xi32>
    %c15_i32 = arith.constant 15 : i32
    %2 = vector.broadcast %c15_i32 : i32 to vector<8x256xi32>
    %3 = arith.andi %1, %2 : vector<8x256xi32>
    %c15_i32_1 = arith.constant 15 : i32
    %4 = vector.broadcast %c15_i32_1 : i32 to vector<8x256xi32>
    %5 = arith.cmpi eq, %3, %4 : vector<8x256xi32>
    %c255_i32 = arith.constant 255 : i32
    %6 = tpu.dynamic_rotate %0 by %c255_i32 dim 1 : vector<8x256xf32>, i32 -> vector<8x256xf32>
    %7 = arith.select %5, %0, %6 : vector<8x256xi1>, vector<8x256xf32>
    %8 = arith.addf %0, %7 : vector<8x256xf32>
    %c240_i32 = arith.constant 240 : i32
    %9 = vector.broadcast %c240_i32 : i32 to vector<8x256xi32>
    %10 = arith.cmpi sge, %1, %9 : vector<8x256xi32>
    %c240_i32_2 = arith.constant 240 : i32
    %11 = tpu.dynamic_rotate %8 by %c240_i32_2 dim 1 : vector<8x256xf32>, i32 -> vector<8x256xf32>
    %12 = arith.select %10, %8, %11 : vector<8x256xi1>, vector<8x256xf32>
    %13 = arith.addf %8, %12 : vector<8x256xf32>
    %cst = arith.constant 2.500000e-01 : f32
    %14 = vector.broadcast %cst : f32 to vector<8x256xf32>
    %15 = arith.mulf %13, %14 : vector<8x256xf32>
    %c0_3 = arith.constant 0 : index
    %c0_4 = arith.constant 0 : index
    %16 = vector.load %arg2[%c0_3, %c0_4] : memref<8x256xf32, #tpu.memory_space<vmem>>, vector<8x256xf32>
    tpu.vector_store %arg2[%c0_3, %c0_4], %15 {strides = array<i32>} : memref<8x256xf32, #tpu.memory_space<vmem>>, vector<8x256xf32>,
    return
  }
  func.func @transform_0(%arg0: i32) -> (i32, i32) {
    %c0_i32 = arith.constant 0 : i32
    %c0_i32_0 = arith.constant 0 : i32
    return %arg0, %c0_i32 : i32, i32
  }
  func.func @transform_1(%arg0: i32) -> (i32, i32) {
    %c0_i32 = arith.constant 0 : i32
    %c0_i32_0 = arith.constant 0 : i32
    return %arg0, %c0_i32 : i32, i32
  }
}

</mosaic_0001>

<bundles_post_ra>
// kernel: tpu_custom_call.1
= control target key start
LH: loop header
LB: loop body
LE: loop exit
PB: predicated region body
PF: predicated region fallthrough
CT: control target
= control target key end

     0   :  { %6 = vsyncpa [#allocation3], 0  ;;  %s153_s0 = inlined_call_operand.hbm [shape: f32[8,256], index: 0, kind: input, shape index: {}]   ;;  %s154_s1 = inlined_call_operand.hbm [shape: f32[8,256], index: 1, kind: output, shape index: {}]  }
   0x1   :  { %7 = vsyncpa [#allocation4], 0  ;;  %s13_s8 = sshll.u32 %s153_s0, 4  ;;  %s133_s9 = smov [#allocation2]   ;;  %s14_s8 = int_to_ptr.hbm [resolvable:$true] %s13_s8 }
   0x2   :  { %s15_s10 = sshll.u32 %s133_s9, 4  ;;  %s16_s10 = int_to_ptr.vmem [resolvable:$true] %s15_s10 }
   0x3   :  { %18 = dma.hbm_to_vmem [thread:$0]  %s14_s8, 256, %s16_s10, [#allocation3]  }
   0x4   :  { %129 = dma.done.wait [#allocation3], 256  }
   0x5   :  { %130 = vsyncadd [#allocation3], 4294967040  ;;  %v23_v0 = vld [vmem:[#allocation2] sm:$0xff]  ;;  %s134_s11 = smov 127   ;;  %v24_v1 = vld [vmem:[#allocation2 + $0x8] sm:$0xff]  ;;  %v25_v2 = vlaneseq  ;;  %s135_s0 = smov 112  }
   0x6   :  { %32 = vrot.lane.b32.xlu0 %v23_v0, %s134_s11  ;;  %s136_s12 = smov [#allocation5]   ;;  %s67_s16 = sshll.u32 %s154_s1, 4  ;;  %s68_s16 = int_to_ptr.hbm [resolvable:$true] %s67_s16 }
   0x7   :  { %v26_v4 = vand.u32 127, %v25_v2  ;;  %s65_s13 = sshll.u32 %s136_s12, 4  ;;  %s66_s13 = int_to_ptr.vmem [resolvable:$true] %s65_s13 }
   0x9   :  { %v28_v5 = vand.u32 15, %v26_v4  ;;  %v27_v6 = vadd.s32 128, %v26_v4  ;;  %vm36_vm0 = vcmp.lt.s32.totalorder %v26_v4, 127  ;;  %vm49_vm3 = vcmp.lt.s32.totalorder %v26_v4, 112 }
   0xb   :  { %vm30_vm1 = vcmp.eq.s32.totalorder %v28_v5, 15  ;;  %v29_v8 = vand.u32 15, %v27_v6  ;;  %vm44_vm4 = vcmp.ge.s32.totalorder %v27_v6, 240 }
   0xd   :  { %vm31_vm2 = vcmp.eq.s32.totalorder %v29_v8, 15 }
   0xe   :  { %34 = vrot.lane.b32.xlu0 %v24_v1, %s134_s11 }
  0x78   :  { %v33_v3 = vpop.permute.xlu0 %32 }
  0x80   :  { %v35_v7 = vpop.permute.xlu0 %34 }
  0x81   :  { %v37_v9 = vsel %vm36_vm0, %v33_v3, %v35_v7  ;;  %v38_v12 = vsel %vm36_vm0, %v35_v7, %v33_v3 }
  0x82   :  { %v39_v10 = vsel %vm30_vm1, %v23_v0, %v37_v9  ;;  %v40_v13 = vsel %vm31_vm2, %v24_v1, %v38_v12 }
  0x83   :  { %v41_v11 = vadd.f32 %v39_v10, %v23_v0  ;;  %v42_v14 = vadd.f32 %v40_v13, %v24_v1 }
  0x85   :  { %45 = vrot.lane.b32.xlu1 %v41_v11, %s135_s0 }
  0x8d   :  { %47 = vrot.lane.b32.xlu1 %v42_v14, %s135_s0 }
  0xf7   :  { %v46_v15 = vpop.permute.xlu1 %45 }
  0xff   :  { %v48_v16 = vpop.permute.xlu1 %47 }
 0x100   :  { %v50_v17 = vsel %vm49_vm3, %v46_v15, %v48_v16  ;;  %v51_v18 = vsel %vm49_vm3, %v48_v16, %v46_v15 }
 0x101   :  { %v53_v19 = vsel %vm44_vm4, %v42_v14, %v51_v18  ;;  %v54_v20 = vadd.f32 %v50_v17, %v41_v11 }
 0x102   :  { %v55_v21 = vadd.f32 %v53_v19, %v42_v14 }
 0x103   :  { %v56_v22 = vmul.f32 0.25, %v54_v20 }
 0x104   :  { %v57_v23 = vmul.f32 0.25, %v55_v21 }
 0x105   :  { %58 = vst [vmem:[#allocation5] sm:$0xff] %v56_v22 }
 0x106   :  { %59 = vst [vmem:[#allocation5 + $0x8] sm:$0xff] %v57_v23 }
 0x107   :  { %70 = dma.vmem_to_hbm [thread:$0]  %s66_s13, 256, %s68_s16, [#allocation4]  }
 0x108   :  { %131 = dma.done.wait [#allocation4], 256  }
 0x109   :  { %132 = vsyncadd [#allocation4], 4294967040 }
 0x10a   :  { %75 = vsyncpa [#allocation3], 1 }
 0x10b   :  { %76 = vsyncpa [#allocation4], 1 }

</bundles_post_ra>
